<compile_context>
chip_gen: v7x
topology: tpu7x:2x2x1
jax: 0.10.0
libtpu: 0.0.40
codegen_flags: <defaults>
</compile_context>

<pallas_src>
import functools

import jax
import jax.numpy as jnp
from jax.experimental import pallas as pl
from jax.experimental.pallas import tpu as pltpu

LANE = 128


def _round_up(a, b):
    return ((a + b - 1) // b) * b


def _gcn_layer_kernel(*refs, has_mask, apply_relu, num_valid_cols, f_pad):
    """One P1-conv layer tile: acc += A[i,k] @ feat[k]; at last k apply the linear head."""
    if has_mask:
        xs_ref, xn_ref, a_ref, w_ref, b_ref, mask_ref, o_ref, acc_ref = refs
    else:
        xs_ref, xn_ref, a_ref, w_ref, b_ref, o_ref, acc_ref = refs
        mask_ref = None

    k = pl.program_id(1)

    @pl.when(k == 0)
    def _():
        acc_ref[...] = jnp.zeros_like(acc_ref)

    # Neighbor aggregation tile: bf16 x bf16 on the MXU, f32 accumulation.
    # (Both operands already stored bf16 in HBM -> no per-step cast.)
    acc_ref[...] += jnp.dot(a_ref[...], xn_ref[...],
                            preferred_element_type=jnp.float32)

    @pl.when(k == pl.num_programs(1) - 1)
    def _():
        # Fused [self | aggregated] @ [W_self ; W_gather] as two sliced bf16 dots
        # (avoids a (tile_m, 2*f_pad) f32 concat temporary and the f32 MXU path).
        w_self = w_ref[pl.ds(0, f_pad), :]
        w_gather = w_ref[pl.ds(f_pad, f_pad), :]
        h = jnp.dot(xs_ref[...], w_self, preferred_element_type=jnp.float32)
        h = h + jnp.dot(acc_ref[...].astype(jnp.bfloat16), w_gather,
                        preferred_element_type=jnp.float32)
        h = h + b_ref[...]
        if apply_relu:
            h = jnp.maximum(h, 0.0)
        if mask_ref is not None:           # training-mode dropout (pre-scaled bf16 keep mask)
            h = h * mask_ref[...]
        if num_valid_cols is not None:     # log_softmax over the real class lanes only
            col = jax.lax.broadcasted_iota(jnp.int32, h.shape, 1)
            valid = col < num_valid_cols
            m = jnp.max(jnp.where(valid, h, -1e30), axis=-1, keepdims=True)
            ex = jnp.where(valid, jnp.exp(h - m), 0.0)
            lse = jnp.log(jnp.sum(ex, axis=-1, keepdims=True))
            h = h - m - lse                # padded lanes hold junk; sliced off in wrapper
        o_ref[...] = h.astype(o_ref.dtype)


def _gcn_layer(feat, a_norm, w_stacked, b_pad, *, mask=None, apply_relu=False,
               num_valid_cols=None, out_dtype=jnp.float32, tile_m, tile_k,
               vmem_limit_bytes):
    n_pad, f_pad = feat.shape
    h_out = w_stacked.shape[1]
    grid = (n_pad // tile_m, n_pad // tile_k)

    kernel = functools.partial(
        _gcn_layer_kernel,
        has_mask=mask is not None,
        apply_relu=apply_relu,
        num_valid_cols=num_valid_cols,
        f_pad=f_pad,
    )

    in_specs = [
        pl.BlockSpec((tile_m, f_pad), lambda i, k: (i, 0)),        # self rows (bf16)
        pl.BlockSpec((tile_k, f_pad), lambda i, k: (k, 0)),        # neighbor rows (bf16)
        pl.BlockSpec((tile_m, tile_k), lambda i, k: (i, k)),       # adjacency tile (bf16)
        pl.BlockSpec((2 * f_pad, h_out), lambda i, k: (0, 0)),     # stacked weight (bf16, pinned)
        pl.BlockSpec((1, h_out), lambda i, k: (0, 0)),             # bias (f32, pinned, tiny)
    ]
    args = [feat, feat, a_norm, w_stacked, b_pad]
    if mask is not None:
        in_specs.append(pl.BlockSpec((tile_m, h_out), lambda i, k: (i, 0)))
        args.append(mask)

    return pl.pallas_call(
        kernel,
        out_shape=jax.ShapeDtypeStruct((n_pad, h_out), out_dtype),
        grid_spec=pltpu.PrefetchScalarGridSpec(
            num_scalar_prefetch=0,
            grid=grid,
            in_specs=in_specs,
            out_specs=pl.BlockSpec((tile_m, h_out), lambda i, k: (i, 0)),
            scratch_shapes=[pltpu.VMEM((tile_m, f_pad), jnp.float32)],
        ),
        compiler_params=pltpu.CompilerParams(
            dimension_semantics=("parallel", "arbitrary"),
            vmem_limit_bytes=vmem_limit_bytes,
        ),
    )(*args)


def _tile_plan(n):
    """VMEM-budget-aware tile plan (per TPU generation)."""
    try:
        vmem_cap = pltpu.get_tpu_info().vmem_capacity_bytes
    except Exception:
        vmem_cap = 64 * 1024 * 1024            # assume smallest (v7x-like) VMEM if query fails
    if vmem_cap >= 100 * 1024 * 1024:          # v5e / v6e: 128 MiB VMEM per TensorCore
        tile_m, tile_k, vmem_limit = 2048, 2048, 96 * 1024 * 1024
    else:                                      # v7x: 64 MiB VMEM, 2 TCs -> keep <=48 MiB
        tile_m, tile_k, vmem_limit = 1024, 2048, 48 * 1024 * 1024
    if n <= 1024:                              # tiny graphs (demo path): single tile
        n_pad = _round_up(n, LANE)
        return n_pad, n_pad, n_pad, min(vmem_limit, 48 * 1024 * 1024)
    n_pad = _round_up(n, tile_k)               # tile_k is a multiple of tile_m
    return n_pad, tile_m, tile_k, vmem_limit


def p1gcn2_prepare(x, adj, params, *, reduction_type="mean"):
    """Graph-/weight-static preprocessing, hoisted out of the per-step forward.

    x: (N, F) f32 node features; adj: (N, N) dense {0,1} adjacency (no self loops).
    Returns everything the per-step forward needs (padded, pre-normalized, bf16-cast).
    """
    w1a, w1b, b1, w2a, w2b, b2 = params
    N, F = x.shape
    H = w1a.shape[1]
    C = w2a.shape[1]

    F_pad = _round_up(F, LANE)
    H_pad = _round_up(H, LANE)
    C_pad = _round_up(C, LANE)
    N_pad, tile_m, tile_k, vmem_limit = _tile_plan(N)

    a = adj.astype(jnp.float32)
    if reduction_type == "mean":
        deg = jnp.sum(a, axis=-1, keepdims=True)
        a = jnp.where(deg > 0.0, a / jnp.maximum(deg, 1.0), 0.0)   # NaN-safe D^-1 A
    a = jnp.zeros((N_pad, N_pad), jnp.float32).at[:N, :N].set(a).astype(jnp.bfloat16)
    # TODO(synk): PubMed adjacency is ~1e-4 dense; block-CSR column lists (scalar prefetch)
    #             + pl.when tile skipping would remove most of this stream and its FLOPs.

    xp = jnp.zeros((N_pad, F_pad), jnp.bfloat16).at[:N, :F].set(x.astype(jnp.bfloat16))

    def stack_pad(wa, wb, fi_pad, fo_pad):
        w = jnp.zeros((2 * fi_pad, fo_pad), jnp.float32)
        w = w.at[:wa.shape[0], :wa.shape[1]].set(wa.astype(jnp.float32))
        w = w.at[fi_pad:fi_pad + wb.shape[0], :wb.shape[1]].set(wb.astype(jnp.float32))
        return w.astype(jnp.bfloat16)

    w1 = stack_pad(w1a, w1b, F_pad, H_pad)
    b1p = jnp.zeros((1, H_pad), jnp.float32).at[:, :H].set(jnp.reshape(b1, (1, H)))
    w2 = stack_pad(w2a, w2b, H_pad, C_pad)
    b2p = jnp.zeros((1, C_pad), jnp.float32).at[:, :C].set(jnp.reshape(b2, (1, C)))

    return dict(xp=xp, a=a, w1=w1, b1=b1p, w2=w2, b2=b2p,
                dims=(N, F, H, C, N_pad, F_pad, H_pad, C_pad),
                tiles=(tile_m, tile_k), vmem_limit=vmem_limit)


def p1gcn2_apply(prep, *, training=True, drop_p=0.5, dropout_key=None):
    """Per-step forward: two tiled pallas_calls over the precomputed graph operands."""
    N, F, H, C, N_pad, F_pad, H_pad, C_pad = prep["dims"]
    tile_m, tile_k = prep["tiles"]
    vmem_limit = prep["vmem_limit"]

    mask = None
    if training and drop_p > 0.0:
        if dropout_key is None:
            dropout_key = jax.random.PRNGKey(0)
        keep = jax.random.bernoulli(dropout_key, 1.0 - drop_p, (N_pad, H_pad))
        mask = (keep.astype(jnp.float32) * (1.0 / (1.0 - drop_p))).astype(jnp.bfloat16)

    # ---- layer 1: gather + Linear(2F->H) + relu + dropout -> bf16 intermediate ----
    h = _gcn_layer(prep["xp"], prep["a"], prep["w1"], prep["b1"],
                   mask=mask, apply_relu=True, num_valid_cols=None,
                   out_dtype=jnp.bfloat16, tile_m=tile_m, tile_k=tile_k,
                   vmem_limit_bytes=vmem_limit)
    # ---- layer 2: gather + Linear(2H->C) + linmaps0 (identity) + log_softmax ----
    out = _gcn_layer(h, prep["a"], prep["w2"], prep["b2"],
                     mask=None, apply_relu=False, num_valid_cols=C,
                     out_dtype=jnp.float32, tile_m=tile_m, tile_k=tile_k,
                     vmem_limit_bytes=vmem_limit)
    return out[:N, :C]


def p1gcn2_forward(x, adj, params, *, reduction_type="mean",
                   training=True, drop_p=0.5, dropout_key=None):
    """Convenience wrapper (prepare + apply). Prefer prepare-once / apply-many in training loops."""
    prep = p1gcn2_prepare(x, adj, params, reduction_type=reduction_type)
    return p1gcn2_apply(prep, training=training, drop_p=drop_p, dropout_key=dropout_key)


def init_params(key, num_features, hidden_channels, num_classes):
    """Deterministic stand-in for ptens.modules.Linear init (uniform +-1/sqrt(fan_in))."""
    ks = jax.random.split(key, 6)
    f_in1 = 2 * num_features
    f_in2 = 2 * hidden_channels
    u = lambda k, shape, fan: jax.random.uniform(
        k, shape, jnp.float32, -1.0 / jnp.sqrt(fan), 1.0 / jnp.sqrt(fan))
    w1a = u(ks[0], (num_features, hidden_channels), f_in1)
    w1b = u(ks[1], (num_features, hidden_channels), f_in1)
    b1 = u(ks[2], (1, hidden_channels), f_in1)
    w2a = u(ks[3], (hidden_channels, num_classes), f_in2)
    w2b = u(ks[4], (hidden_channels, num_classes), f_in2)
    b2 = u(ks[5], (1, num_classes), f_in2)
    return (w1a, w1b, b1, w2a, w2b, b2)


def reference_forward(x, adj, params, *, reduction_type="mean"):
    """Pure-JAX reference (eval mode), mirroring the kernel's bf16 operand precision."""
    w1a, w1b, b1, w2a, w2b, b2 = params
    a = adj.astype(jnp.float32)
    if reduction_type == "mean":
        deg = jnp.sum(a, axis=-1, keepdims=True)
        a = jnp.where(deg > 0.0, a / jnp.maximum(deg, 1.0), 0.0)
    a_b = a.astype(jnp.bfloat16)
    bf = lambda t: t.astype(jnp.bfloat16)

    x_b = bf(x)
    agg1 = jnp.dot(a_b, x_b, preferred_element_type=jnp.float32)
    h = (jnp.dot(x_b, bf(w1a), preferred_element_type=jnp.float32)
         + jnp.dot(bf(agg1), bf(w1b), preferred_element_type=jnp.float32) + b1)
    h = jnp.maximum(h, 0.0)

    h_b = bf(h)                                     # layer-1 intermediate stored bf16
    agg2 = jnp.dot(a_b, h_b, preferred_element_type=jnp.float32)
    logits = (jnp.dot(h_b, bf(w2a), preferred_element_type=jnp.float32)
              + jnp.dot(bf(agg2), bf(w2b), preferred_element_type=jnp.float32) + b2)
    return jax.nn.log_softmax(logits, axis=-1)


if __name__ == "__main__":
    # small synthetic stand-in for PubMed: N nodes, F features, H hidden, C=3 classes
    N, F, H, C, E = 64, 32, 32, 3, 256

    key = jax.random.PRNGKey(0)
    kx, ke1, ke2, kp, kd = jax.random.split(key, 5)

    x = jax.random.normal(kx, (N, F), dtype=jnp.float32)

    # random symmetric edge_index -> dense adjacency (glue in plain JAX)
    src = jax.random.randint(ke1, (E,), 0, N)
    dst = jax.random.randint(ke2, (E,), 0, N)
    adj = jnp.zeros((N, N), jnp.float32).at[dst, src].set(1.0)
    adj = jnp.maximum(adj, adj.T)
    adj = adj * (1.0 - jnp.eye(N, dtype=jnp.float32))   # no self loops

    params = init_params(kp, F, H, C)

    # graph/weight preprocessing done ONCE, reused for both runs (hoisted per review)
    prep = p1gcn2_prepare(x, adj, params, reduction_type="mean")

    # eval-mode (deterministic) run vs pure-JAX reference
    out_eval = jax.block_until_ready(p1gcn2_apply(prep, training=False))
    ref = reference_forward(x, adj, params, reduction_type="mean")
    assert out_eval.shape == (N, C), out_eval.shape
    err = float(jnp.max(jnp.abs(out_eval - ref)))
    assert jnp.allclose(out_eval, ref, atol=3e-2, rtol=3e-2), f"max abs err {err}"

    # training-mode run (dropout active)
    out_train = jax.block_until_ready(
        p1gcn2_apply(prep, training=True, drop_p=0.5, dropout_key=kd))
    assert out_train.shape == (N, C), out_train.shape
    assert bool(jnp.all(jnp.isfinite(out_train)))
    # log_softmax rows normalize
    assert bool(jnp.allclose(jnp.sum(jnp.exp(out_train), axis=1), 1.0, atol=1e-2))

    print("KERNEL_OK")
</pallas_src>

<mosaic_0001>
module attributes {stable_mosaic.version = 11 : i64} {
  func.func @_gcn_layer_kernel(%arg0: i32, %arg1: i32, %arg2: memref<128x128xbf16, #tpu.memory_space<vmem>>, %arg3: memref<128x128xbf16, #tpu.memory_space<vmem>>, %arg4: memref<128x128xbf16, #tpu.memory_space<vmem>>, %arg5: memref<256x128xbf16, #tpu.memory_space<vmem>>, %arg6: memref<1x128xf32, #tpu.memory_space<vmem>>, %arg7: memref<128x128xbf16, #tpu.memory_space<vmem>>, %arg8: memref<128x128xf32, #tpu.memory_space<vmem>>) attributes {dimension_semantics = [#tpu.dimension_semantics<parallel>, #tpu.dimension_semantics<arbitrary>], iteration_bounds = array<i64: 1, 1>, scalar_prefetch = 0 : i64, scratch_operands = 1 : i64, tpu.core_type = #tpu.core_type<tc>, window_params = [{transform_indices = @transform_0, window_bounds = array<i64: 128, 128>}, {transform_indices = @transform_1, window_bounds = array<i64: 128, 128>}, {transform_indices = @transform_2, window_bounds = array<i64: 128, 128>}, {pipeline_mode = #tpu.pipeline_mode<synchronous>, transform_indices = @transform_3, window_bounds = array<i64: 256, 128>}, {pipeline_mode = #tpu.pipeline_mode<synchronous>, transform_indices = @transform_4, window_bounds = array<i64: 1, 128>}, {transform_indices = @transform_5, window_bounds = array<i64: 128, 128>}]} {
    %c0_i32 = arith.constant 0 : i32
    %0 = arith.cmpi eq, %arg1, %c0_i32 : i32
    %1 = arith.extui %0 : i1 to i32
    %c0_i32_0 = arith.constant 0 : i32
    %2 = arith.cmpi ne, %1, %c0_i32_0 : i32
    scf.if %2 {
      %cst_10 = arith.constant 0.000000e+00 : f32
      %12 = vector.broadcast %cst_10 : f32 to vector<128x128xf32>
      %c0_11 = arith.constant 0 : index
      %c0_12 = arith.constant 0 : index
      %13 = vector.load %arg8[%c0_11, %c0_12] : memref<128x128xf32, #tpu.memory_space<vmem>>, vector<128x128xf32>
      tpu.vector_store %arg8[%c0_11, %c0_12], %12 {strides = array<i32>} : memref<128x128xf32, #tpu.memory_space<vmem>>, vector<128x128xf32>,
    } else {
    }
    %c0 = arith.constant 0 : index
    %c0_1 = arith.constant 0 : index
    %3 = vector.load %arg8[%c0, %c0_1] : memref<128x128xf32, #tpu.memory_space<vmem>>, vector<128x128xf32>
    %c0_2 = arith.constant 0 : index
    %c0_3 = arith.constant 0 : index
    %4 = vector.load %arg4[%c0_2, %c0_3] : memref<128x128xbf16, #tpu.memory_space<vmem>>, vector<128x128xbf16>
    %c0_4 = arith.constant 0 : index
    %c0_5 = arith.constant 0 : index
    %5 = vector.load %arg3[%c0_4, %c0_5] : memref<128x128xbf16, #tpu.memory_space<vmem>>, vector<128x128xbf16>
    %cst = arith.constant dense<0.000000e+00> : vector<128x128xf32>
    %6 = tpu.matmul %4, %5, %cst {dimension_numbers = #tpu.dot_dimension_numbers<[1], [0], [0], [1], [0, 0, 1, 1], [], []>} : vector<128x128xbf16>, vector<128x128xbf16>, vector<128x128xf32> -> vector<128x128xf32>
    %7 = arith.addf %3, %6 : vector<128x128xf32>
    %c0_6 = arith.constant 0 : index
    %c0_7 = arith.constant 0 : index
    %8 = vector.load %arg8[%c0_6, %c0_7] : memref<128x128xf32, #tpu.memory_space<vmem>>, vector<128x128xf32>
    tpu.vector_store %arg8[%c0_6, %c0_7], %7 {strides = array<i32>} : memref<128x128xf32, #tpu.memory_space<vmem>>, vector<128x128xf32>,
    %c0_i32_8 = arith.constant 0 : i32
    %9 = arith.cmpi eq, %arg1, %c0_i32_8 : i32
    %10 = arith.extui %9 : i1 to i32
    %c0_i32_9 = arith.constant 0 : i32
    %11 = arith.cmpi ne, %10, %c0_i32_9 : i32
    scf.if %11 {
      %c0_10 = arith.constant 0 : index
      %c0_11 = arith.constant 0 : index
      %12 = vector.load %arg5[%c0_10, %c0_11] : memref<256x128xbf16, #tpu.memory_space<vmem>>, vector<128x128xbf16>
      %c128 = arith.constant 128 : index
      %c0_12 = arith.constant 0 : index
      %13 = vector.load %arg5[%c128, %c0_12] : memref<256x128xbf16, #tpu.memory_space<vmem>>, vector<128x128xbf16>
      %c0_13 = arith.constant 0 : index
      %c0_14 = arith.constant 0 : index
      %14 = vector.load %arg2[%c0_13, %c0_14] : memref<128x128xbf16, #tpu.memory_space<vmem>>, vector<128x128xbf16>
      %cst_15 = arith.constant dense<0.000000e+00> : vector<128x128xf32>
      %15 = tpu.matmul %14, %12, %cst_15 {dimension_numbers = #tpu.dot_dimension_numbers<[1], [0], [0], [1], [0, 0, 1, 1], [], []>} : vector<128x128xbf16>, vector<128x128xbf16>, vector<128x128xf32> -> vector<128x128xf32>
      %c0_16 = arith.constant 0 : index
      %c0_17 = arith.constant 0 : index
      %16 = vector.load %arg8[%c0_16, %c0_17] : memref<128x128xf32, #tpu.memory_space<vmem>>, vector<128x128xf32>
      %17 = arith.truncf %16 : vector<128x128xf32> to vector<128x128xbf16>
      %cst_18 = arith.constant dense<0.000000e+00> : vector<128x128xf32>
      %18 = tpu.matmul %17, %13, %cst_18 {dimension_numbers = #tpu.dot_dimension_numbers<[1], [0], [0], [1], [0, 0, 1, 1], [], []>} : vector<128x128xbf16>, vector<128x128xbf16>, vector<128x128xf32> -> vector<128x128xf32>
      %19 = arith.addf %15, %18 : vector<128x128xf32>
      %c0_19 = arith.constant 0 : index
      %c0_20 = arith.constant 0 : index
      %20 = vector.load %arg6[%c0_19, %c0_20] : memref<1x128xf32, #tpu.memory_space<vmem>>, vector<1x128xf32>
      %21 = vector.broadcast %20 : vector<1x128xf32> to vector<128x128xf32>
      %22 = arith.addf %19, %21 : vector<128x128xf32>
      %cst_21 = arith.constant 0.000000e+00 : f32
      %23 = vector.broadcast %cst_21 : f32 to vector<128x128xf32>
      %24 = arith.maximumf %22, %23 : vector<128x128xf32>
      %25 = arith.truncf %24 : vector<128x128xf32> to vector<128x128xbf16>
      %c0_22 = arith.constant 0 : index
      %c0_23 = arith.constant 0 : index
      %26 = vector.load %arg7[%c0_22, %c0_23] : memref<128x128xbf16, #tpu.memory_space<vmem>>, vector<128x128xbf16>
      tpu.vector_store %arg7[%c0_22, %c0_23], %25 {strides = array<i32>} : memref<128x128xbf16, #tpu.memory_space<vmem>>, vector<128x128xbf16>,
    } else {
    }
    return
  }
  func.func @transform_0(%arg0: i32, %arg1: i32) -> (i32, i32) {
    %c0_i32 = arith.constant 0 : i32
    %c0_i32_0 = arith.constant 0 : i32
    return %arg0, %c0_i32 : i32, i32
  }
  func.func @transform_1(%arg0: i32, %arg1: i32) -> (i32, i32) {
    %c0_i32 = arith.constant 0 : i32
    %c0_i32_0 = arith.constant 0 : i32
    return %arg1, %c0_i32 : i32, i32
  }
  func.func @transform_2(%arg0: i32, %arg1: i32) -> (i32, i32) {
    %c0_i32 = arith.constant 0 : i32
    return %arg0, %arg1 : i32, i32
  }
  func.func @transform_3(%arg0: i32, %arg1: i32) -> (i32, i32) {
    %c0_i32 = arith.constant 0 : i32
    %c0_i32_0 = arith.constant 0 : i32
    %c0_i32_1 = arith.constant 0 : i32
    return %c0_i32, %c0_i32_0 : i32, i32
  }
  func.func @transform_4(%arg0: i32, %arg1: i32) -> (i32, i32) {
    %c0_i32 = arith.constant 0 : i32
    %c0_i32_0 = arith.constant 0 : i32
    %c0_i32_1 = arith.constant 0 : i32
    return %c0_i32, %c0_i32_0 : i32, i32
  }
  func.func @transform_5(%arg0: i32, %arg1: i32) -> (i32, i32) {
    %c0_i32 = arith.constant 0 : i32
    %c0_i32_0 = arith.constant 0 : i32
    return %arg0, %c0_i32 : i32, i32
  }
}

</mosaic_0001>

<bundles_post_ra>
// kernel: tpu_custom_call.1
= control target key start
LH: loop header
LB: loop body
LE: loop exit
PB: predicated region body
PF: predicated region fallthrough
CT: control target
= control target key end

     0   :  { %10 = vsyncpa [#allocation4], 0  ;;  %s1571_s0 = inlined_call_operand.hbm [shape: bf16[128,128], index: 0, kind: input, shape index: {}]   ;;  %s1572_s1 = inlined_call_operand.hbm [shape: bf16[128,128], index: 1, kind: input, shape index: {}]   ;;  %s1573_s2 = inlined_call_operand.hbm [shape: bf16[128,128], index: 2, kind: input, shape index: {}]   ;;  %s1574_s3 = inlined_call_operand.hbm [shape: bf16[256,128], index: 3, kind: input, shape index: {}]   ;;  %s1575_s4 = inlined_call_operand.vmem [shape: f32[1,128], index: 4, kind: input, shape index: {}]   ;;  %s1576_s5 = inlined_call_operand.hbm [shape: bf16[128,128], index: 5, kind: output, shape index: {}]  }
   0x1   :  { %11 = vsyncpa [#allocation7], 0 }
   0x2   :  { %12 = vsyncpa [#allocation10], 0 }
   0x3   :  { %13 = vsyncpa [#allocation5], 0  ;;  %s1382_s18 = smov [#allocation6]   ;;  %s1383_s20 = smov [#allocation3]  }
   0x4   :  { %s31_s19 = sshll.u32 %s1382_s18, 4  ;;  %s19_s21 = sshll.u32 %s1383_s20, 4  ;;  %s32_s19 = int_to_ptr.vmem [resolvable:$true] %s31_s19  ;;  %s1419_s21 = int_to_ptr.vmem [resolvable:$true] %s19_s21 }
   0x5   :  { %s1264_s24 = scalar_lea.hbm %s1572_s1, 1024 }
   0x6   :  { %p1265_p0 = scmp.ne.s32.totalorder %s1572_s1, %s1264_s24  ;;  %p1268_p1 = scmp.lt.u32.totalorder %s1264_s24, %s1572_s1 }
   0x8   :  { %p1270_p2 = pnand %p1268_p1, %p1265_p0 }
   0xa   :  { %1273 = shalt.err (!%p1270_p2)
}
   0xb   :  { %s1274_s29 = scalar_lea.vmem %s32_s19, 1024  ;;  %p1279_p4 = scmp.lt.s32.totalorder %s32_s19, %s32_s19 }
   0xc   :  { %p1275_p3 = scmp.ne.s32.totalorder %s32_s19, %s1274_s29  ;;  %p1280_p5 = scmp.lt.s32.totalorder %s1274_s29, %s1274_s29 }
   0xe   :  { %p1281_p6 = por %p1280_p5, %p1279_p4 }
  0x10   :  { %p1282_p7 = pnand %p1281_p6, %p1275_p3 }
  0x12   :  { %1285 = shalt.err (!%p1282_p7)
}
  0x13   :  { %s1384_s30 = smov 64   ;;  %s1385_s6 = smov 4  }
  0x14   :  { %37 = dma.hbm_to_vmem [thread:$0]  %s1572_s1, 1024, %s32_s19, [#allocation7], %s1384_s30, %s1384_s30, %s1385_s6  }
  0x15   :  { %s1286_s11 = scalar_lea.hbm %s1571_s0, 1024 }
  0x16   :  { %p1287_p8 = scmp.ne.s32.totalorder %s1571_s0, %s1286_s11  ;;  %p1290_p9 = scmp.lt.u32.totalorder %s1286_s11, %s1571_s0 }
  0x18   :  { %p1292_p10 = pnand %p1290_p9, %p1287_p8 }
  0x1a   :  { %1295 = shalt.err (!%p1292_p10)
}
  0x1b   :  { %s1296_s16 = scalar_lea.vmem %s1419_s21, 1024  ;;  %p1301_p12 = scmp.lt.s32.totalorder %s1419_s21, %s1419_s21 }
  0x1c   :  { %p1297_p11 = scmp.ne.s32.totalorder %s1419_s21, %s1296_s16  ;;  %p1302_p13 = scmp.lt.s32.totalorder %s1296_s16, %s1296_s16 }
  0x1e   :  { %p1303_p0 = por %p1302_p13, %p1301_p12 }
  0x20   :  { %p1304_p1 = pnand %p1303_p0, %p1297_p11 }
  0x22   :  { %1307 = shalt.err (!%p1304_p1)
}
  0x23   :  { %25 = dma.hbm_to_vmem [thread:$0]  %s1571_s0, 1024, %s1419_s21, [#allocation4], %s1384_s30, %s1384_s30, %s1385_s6  }
  0x24   :  { %s1386_s18 = smov [#allocation8]   ;;  %s1387_s20 = smov [#allocation9]  }
  0x25   :  { %s43_s19 = sshll.u32 %s1386_s18, 4  ;;  %s55_s22 = sshll.u32 %s1387_s20, 4  ;;  %s44_s19 = int_to_ptr.vmem [resolvable:$true] %s43_s19  ;;  %s1456_s22 = int_to_ptr.vmem [resolvable:$true] %s55_s22 }
  0x26   :  { %s1308_s25 = scalar_lea.hbm %s1573_s2, 1024 }
  0x27   :  { %p1309_p2 = scmp.ne.s32.totalorder %s1573_s2, %s1308_s25  ;;  %p1312_p3 = scmp.lt.u32.totalorder %s1308_s25, %s1573_s2 }
  0x29   :  { %p1314_p4 = pnand %p1312_p3, %p1309_p2 }
  0x2b   :  { %1317 = shalt.err (!%p1314_p4)
}
  0x2c   :  { %s1318_s0 = scalar_lea.vmem %s44_s19, 1024  ;;  %p1323_p6 = scmp.lt.s32.totalorder %s44_s19, %s44_s19 }
  0x2d   :  { %p1319_p5 = scmp.ne.s32.totalorder %s44_s19, %s1318_s0  ;;  %p1324_p7 = scmp.lt.s32.totalorder %s1318_s0, %s1318_s0 }
  0x2f   :  { %p1325_p8 = por %p1324_p7, %p1323_p6 }
  0x31   :  { %p1326_p9 = pnand %p1325_p8, %p1319_p5 }
  0x33   :  { %1329 = shalt.err (!%p1326_p9)
}
  0x34   :  { %49 = dma.hbm_to_vmem [thread:$0]  %s1573_s2, 1024, %s44_s19, [#allocation7], %s1384_s30, %s1384_s30, %s1385_s6  }
  0x35   :  { %s1330_s10 = scalar_lea.hbm %s1574_s3, 2048 }
  0x36   :  { %p1331_p10 = scmp.ne.s32.totalorder %s1574_s3, %s1330_s10  ;;  %p1334_p11 = scmp.lt.u32.totalorder %s1330_s10, %s1574_s3 }
  0x38   :  { %p1336_p12 = pnand %p1334_p11, %p1331_p10 }
  0x3a   :  { %1339 = shalt.err (!%p1336_p12)
}
  0x3b   :  { %s1340_s15 = scalar_lea.vmem %s1456_s22, 2048  ;;  %p1345_p0 = scmp.lt.s32.totalorder %s1456_s22, %s1456_s22 }
  0x3c   :  { %p1341_p13 = scmp.ne.s32.totalorder %s1456_s22, %s1340_s15  ;;  %p1346_p1 = scmp.lt.s32.totalorder %s1340_s15, %s1340_s15 }
  0x3e   :  { %p1347_p2 = por %p1346_p1, %p1345_p0 }
  0x40   :  { %p1348_p3 = pnand %p1347_p2, %p1341_p13 }
  0x42   :  { %1351 = shalt.err (!%p1348_p3)
}
  0x43   :  { %61 = dma.hbm_to_vmem [thread:$0]  %s1574_s3, 2048, %s1456_s22, [#allocation10], %s1384_s30, %s1384_s30, %s1385_s6  }
  0x44   :  { %1374 = dma.done.wait [#allocation4], 1024  }
  0x45   :  { %1375 = vsyncadd [#allocation4], 4294966272 }
  0x46   :  { %1376 = dma.done.wait [#allocation7], 2048  }
  0x47   :  { %1377 = vsyncadd [#allocation7], 4294965248 }
  0x48   :  { %1378 = dma.done.wait [#allocation10], 2048  }
  0x49   :  { %1379 = vsyncadd [#allocation10], 4294965248  ;;  %v1224_v0 = vld [vmem:[#allocation6] sm:$0xff]   ;;  %v1225_v1 = vld [vmem:[#allocation6 + $0x8] sm:$0xff]  }
  0x4a   :  { %1089 = vmatprep.subr.bf16.mxu0 %v1224_v0  ;;  %v1226_v2 = vld [vmem:[#allocation6 + $0x10] sm:$0xff]   ;;  %v1227_v3 = vld [vmem:[#allocation6 + $0x18] sm:$0xff]   ;;  %v1232_v4 = vld [vmem:[#allocation8] sm:$0xff]  }
  0x4b   :  { %1090 = vmatpush3.bf16.msra.mxu0 %v1224_v0  ;;  %1105 = vmatprep.mubr.bf16.mxu0 %v1232_v4  ;;  %v1228_v5 = vld [vmem:[#allocation6 + $0x20] sm:$0xff]   ;;  %v1229_v6 = vld [vmem:[#allocation6 + $0x28] sm:$0xff]   ;;  %v1230_v9 = vld [vmem:[#allocation6 + $0x30] sm:$0xff]  }
  0x4c   :  { %1091 = vmatprep.subr.bf16.mxu0 %v1225_v1  ;;  %v1240_v7 = vld [vmem:[#allocation9 + $0x40] sm:$0xff]   ;;  %v1242_v8 = vld [vmem:[#allocation9 + $0x48] sm:$0xff]   ;;  %v1244_v10 = vld [vmem:[#allocation9 + $0x50] sm:$0xff]  }
  0x4d   :  { %1121 = vmatprep.subr.bf16.mxu1 %v1240_v7  ;;  %v1231_v11 = vld [vmem:[#allocation6 + $0x38] sm:$0xff]   ;;  %v1493_v13 = vld [vmem:[#allocation9] sm:$0xff]   ;;  %v1233_v14 = vld [vmem:[#allocation8 + $0x8] sm:$0xff]  }
  0x4e   :  { %1122 = vmatpush3.bf16.msra.mxu1 %v1240_v7  ;;  %v1246_v12 = vld [vmem:[#allocation9 + $0x58] sm:$0xff]   ;;  %v1248_v15 = vld [vmem:[#allocation9 + $0x60] sm:$0xff]   ;;  %v1234_v16 = vld [vmem:[#allocation8 + $0x10] sm:$0xff]  }
  0x4f   :  { %1092 = vmatpush3.bf16.msra.mxu0 %v1225_v1  ;;  %1123 = vmatprep.subr.bf16.mxu1 %v1242_v8  ;;  %v1495_v17 = vld [vmem:[#allocation9 + $0x8] sm:$0xff]   ;;  %v1500_v19 = vld [vmem:[#allocation9 + $0x10] sm:$0xff]   ;;  %v1235_v21 = vld [vmem:[#allocation8 + $0x18] sm:$0xff]  }
  0x50   :  { %1093 = vmatprep.subr.bf16.mxu0 %v1226_v2  ;;  %v1250_v18 = vld [vmem:[#allocation9 + $0x68] sm:$0xff]   ;;  %v1252_v20 = vld [vmem:[#allocation9 + $0x70] sm:$0xff]   ;;  %v1236_v22 = vld [vmem:[#allocation8 + $0x20] sm:$0xff]  }
  0x51   :  { %v1504_v23 = vld [vmem:[#allocation9 + $0x18] sm:$0xff]   ;;  %v1508_v24 = vld [vmem:[#allocation9 + $0x20] sm:$0xff]   ;;  %v1237_v25 = vld [vmem:[#allocation8 + $0x28] sm:$0xff]  }
  0x52   :  { %1124 = vmatpush3.bf16.msra.mxu1 %v1242_v8  ;;  %v1238_v26 = vld [vmem:[#allocation8 + $0x30] sm:$0xff]   ;;  %v1512_v27 = vld [vmem:[#allocation9 + $0x28] sm:$0xff]   ;;  %v1239_v29 = vld [vmem:[#allocation8 + $0x38] sm:$0xff]  }
  0x53   :  { %1094 = vmatpush3.bf16.msra.mxu0 %v1226_v2  ;;  %1125 = vmatprep.subr.bf16.mxu1 %v1244_v10  ;;  %v1516_v28 = vld [vmem:[#allocation9 + $0x30] sm:$0xff]   ;;  %v1254_v30 = vld [vmem:[#allocation9 + $0x78] sm:$0xff]   ;;  %v1256_v32 = vld [vmem:[#allocation3] sm:$0xff]  }
  0x54   :  { %1095 = vmatprep.subr.bf16.mxu0 %v1227_v3  ;;  %v1255_v31 = vld [vmem:[#allocation9 + $0x38] sm:$0xff]   ;;  %v1257_v33 = vld [vmem:[#allocation3 + $0x8] sm:$0xff]   ;;  %v1258_v34 = vld [vmem:[#allocation3 + $0x10] sm:$0xff]  }
  0x55   :  { %v1259_v35 = vld [vmem:[#allocation3 + $0x18] sm:$0xff]   ;;  %v1260_v60 = vld [vmem:[#allocation3 + $0x20] sm:$0xff]   ;;  %v1261_v61 = vld [vmem:[#allocation3 + $0x28] sm:$0xff]  }
  0x56   :  { %1126 = vmatpush3.bf16.msra.mxu1 %v1244_v10  ;;  %v1262_v62 = vld [vmem:[#allocation3 + $0x30] sm:$0xff]   ;;  %v1263_v63 = vld [vmem:[#allocation3 + $0x38] sm:$0xff]  }
  0x57   :  { %1096 = vmatpush3.bf16.msra.mxu0 %v1227_v3  ;;  %1127 = vmatprep.subr.bf16.mxu1 %v1246_v12 }
  0x58   :  { %1097 = vmatprep.subr.bf16.mxu0 %v1228_v5 }
  0x5a   :  { %1128 = vmatpush3.bf16.msra.mxu1 %v1246_v12 }
  0x5b   :  { %1098 = vmatpush3.bf16.msra.mxu0 %v1228_v5  ;;  %1129 = vmatprep.subr.bf16.mxu1 %v1248_v15 }
  0x5c   :  { %1099 = vmatprep.subr.bf16.mxu0 %v1229_v6 }
  0x5e   :  { %1130 = vmatpush3.bf16.msra.mxu1 %v1248_v15 }
  0x5f   :  { %1100 = vmatpush3.bf16.msra.mxu0 %v1229_v6  ;;  %1131 = vmatprep.subr.bf16.mxu1 %v1250_v18 }
  0x60   :  { %1101 = vmatprep.subr.bf16.mxu0 %v1230_v9 }
  0x62   :  { %1132 = vmatpush3.bf16.msra.mxu1 %v1250_v18 }
  0x63   :  { %1102 = vmatpush3.bf16.msra.mxu0 %v1230_v9  ;;  %1133 = vmatprep.subr.bf16.mxu1 %v1252_v20  ;;  %v1538_v9 = vld [vmem:[%s1575_s4] ss:$0 sm:$0xff]  ;;  %s1388_s4 = smov [#allocation11]  }
  0x64   :  { %1103 = vmatprep.subr.bf16.mxu0 %v1231_v11  ;;  %s907_s17 = sshll.u32 %s1388_s4, 4  ;;  %s908_s17 = int_to_ptr.vmem [resolvable:$true] %s907_s17 }
  0x65   :  { %s1352_s18 = scalar_lea.vmem %s908_s17, 1024  ;;  %p1357_p5 = scmp.lt.s32.totalorder %s908_s17, %s908_s17 }
  0x66   :  { %1134 = vmatpush3.bf16.msra.mxu1 %v1252_v20  ;;  %p1353_p4 = scmp.ne.s32.totalorder %s908_s17, %s1352_s18  ;;  %p1358_p6 = scmp.lt.s32.totalorder %s1352_s18, %s1352_s18 }
  0x67   :  { %1104 = vmatpush3.bf16.msra.mxu0 %v1231_v11  ;;  %1135 = vmatprep.subr.bf16.mxu1 %v1254_v30 }
  0x68   :  { %1153 = vmatprep.subr.bf16.mxu0 %v1493_v13  ;;  %p1359_p7 = por %p1358_p6, %p1357_p5 }
  0x6a   :  { %1106 = vmatmul.mubr.bf16.vlgmr.msra.gmra.mrb[0].mxu0 %v1233_v14  ;;  %1136 = vmatpush3.bf16.msra.mxu1 %v1254_v30  ;;  %p1360_p8 = pnand %p1359_p7, %p1353_p4 }
  0x6b   :  { %1109 = vmatprep.mubr.bf16.mxu0 %v1234_v16  ;;  %1154 = vmatpush3.bf16.msra.mxu0 %v1493_v13 }
  0x6c   :  { %1155 = vmatprep.subr.bf16.mxu0 %v1495_v17  ;;  %1185 = vmatprep.subr.bf16.mxu1 %v1493_v13 }
  0x6f   :  { %1156 = vmatpush3.bf16.msra.mxu0 %v1495_v17 }
  0x70   :  { %1157 = vmatprep.subr.bf16.mxu0 %v1500_v19 }
  0x72   :  { %1110 = vmatmul.mubr.bf16.gmra.mrb[4].mxu0 %v1235_v21 }
  0x73   :  { %1113 = vmatprep.mubr.bf16.mxu0 %v1236_v22  ;;  %1158 = vmatpush3.bf16.msra.mxu0 %v1500_v19 }
  0x74   :  { %1159 = vmatprep.subr.bf16.mxu0 %v1504_v23 }
  0x77   :  { %1160 = vmatpush3.bf16.msra.mxu0 %v1504_v23 }
  0x78   :  { %1161 = vmatprep.subr.bf16.mxu0 %v1508_v24 }
  0x7a   :  { %1114 = vmatmul.mubr.bf16.gmra.mrb[8].mxu0 %v1237_v25 }
  0x7b   :  { %1117 = vmatprep.mubr.bf16.mxu0 %v1238_v26  ;;  %1162 = vmatpush3.bf16.msra.mxu0 %v1508_v24 }
  0x7c   :  { %1163 = vmatprep.subr.bf16.mxu0 %v1512_v27 }
  0x7f   :  { %1164 = vmatpush3.bf16.msra.mxu0 %v1512_v27 }
  0x80   :  { %1165 = vmatprep.subr.bf16.mxu0 %v1516_v28 }
  0x82   :  { %1118 = vmatmul.mubr.bf16.gmra.mrb[12].mxu0 %v1239_v29 }
  0x83   :  { %1166 = vmatpush3.bf16.msra.mxu0 %v1516_v28  ;;  %1169 = vmatprep.mubr.bf16.mxu0 %v1256_v32 }
  0x84   :  { %1167 = vmatprep.subr.bf16.mxu0 %v1255_v31 }
  0x87   :  { %1168 = vmatpush3.bf16.msra.mxu0 %v1255_v31 }
  0x8a   :  { %1170 = vmatmul.mubr.bf16.vlgmr.msra.gmra.mrb[16].mxu0 %v1257_v33 }
  0x8b   :  { %1173 = vmatprep.mubr.bf16.mxu0 %v1258_v34 }
  0x92   :  { %1174 = vmatmul.mubr.bf16.gmra.mrb[20].mxu0 %v1259_v35 }
 0x13d   :  { %v1107_v36 = vpop.f32.mrb[0].mxu0 }
 0x13e   :  { %v275_v37 = vpop.f32.mrb[1].mxu0 }
 0x13f   :  { %v1108_v38 = vpop.f32.mrb[2].mxu0 }
 0x140   :  { %v438_v39 = vpack.c.bf16 %v1108_v38, %v1107_v36  ;;  %v278_v40 = vpop.f32.mrb[3].mxu0 }
 0x141   :  { %v437_v41 = vpack.c.bf16 %v278_v40, %v275_v37 }
 0x143   :  { %1137 = vmatprep.mubr.bf16.mxu1 %v437_v41 }
 0x144   :  { %1138 = vmatmul.mubr.bf16.vlgmr.msra.gmra.mrb[0].mxu1 %v438_v39 }
 0x145   :  { %1193 = vmatpush3.bf16.msra.mxu1 %v1493_v13  ;;  %v1111_v42 = vpop.f32.mrb[4].mxu0 }
 0x146   :  { %v291_v43 = vpop.f32.mrb[5].mxu0  ;;  %1186 = vmatprep.subr.bf16.mxu1 %v1495_v17 }
 0x147   :  { %v1112_v44 = vpop.f32.mrb[6].mxu0 }
 0x148   :  { %v440_v45 = vpack.c.bf16 %v1112_v44, %v1111_v42  ;;  %v294_v46 = vpop.f32.mrb[7].mxu0 }
 0x149   :  { %v439_v47 = vpack.c.bf16 %v294_v46, %v291_v43  ;;  %1194 = vmatpush3.bf16.msra.mxu1 %v1495_v17 }
 0x14a   :  { %1187 = vmatprep.subr.bf16.mxu1 %v1500_v19 }
 0x14b   :  { %1141 = vmatprep.mubr.bf16.mxu1 %v439_v47 }
 0x14c   :  { %1142 = vmatmul.mubr.bf16.gmra.mrb[4].mxu1 %v440_v45 }
 0x14d   :  { %1195 = vmatpush3.bf16.msra.mxu1 %v1500_v19  ;;  %v1115_v48 = vpop.f32.mrb[8].mxu0 }
 0x14e   :  { %v307_v49 = vpop.f32.mrb[9].mxu0  ;;  %1188 = vmatprep.subr.bf16.mxu1 %v1504_v23 }
 0x14f   :  { %v1116_v50 = vpop.f32.mrb[10].mxu0 }
 0x150   :  { %v442_v51 = vpack.c.bf16 %v1116_v50, %v1115_v48  ;;  %v310_v52 = vpop.f32.mrb[11].mxu0 }
 0x151   :  { %v441_v53 = vpack.c.bf16 %v310_v52, %v307_v49  ;;  %1196 = vmatpush3.bf16.msra.mxu1 %v1504_v23 }
 0x152   :  { %1189 = vmatprep.subr.bf16.mxu1 %v1508_v24 }
 0x153   :  { %1145 = vmatprep.mubr.bf16.mxu1 %v441_v53 }
 0x154   :  { %1146 = vmatmul.mubr.bf16.gmra.mrb[8].mxu1 %v442_v51 }
 0x155   :  { %1197 = vmatpush3.bf16.msra.mxu1 %v1508_v24  ;;  %v1119_v54 = vpop.f32.mrb[12].mxu0 }
 0x156   :  { %v323_v55 = vpop.f32.mrb[13].mxu0  ;;  %1190 = vmatprep.subr.bf16.mxu1 %v1512_v27 }
 0x157   :  { %v1120_v56 = vpop.f32.mrb[14].mxu0 }
 0x158   :  { %v444_v57 = vpack.c.bf16 %v1120_v56, %v1119_v54  ;;  %v326_v58 = vpop.f32.mrb[15].mxu0 }
 0x159   :  { %v443_v59 = vpack.c.bf16 %v326_v58, %v323_v55  ;;  %1198 = vmatpush3.bf16.msra.mxu1 %v1512_v27 }
 0x15a   :  { %1191 = vmatprep.subr.bf16.mxu1 %v1516_v28 }
 0x15b   :  { %1149 = vmatprep.mubr.bf16.mxu1 %v443_v59 }
 0x15c   :  { %1150 = vmatmul.mubr.bf16.gmra.mrb[12].mxu1 %v444_v57 }
 0x15d   :  { %1199 = vmatpush3.bf16.msra.mxu1 %v1516_v28  ;;  %1177 = vmatprep.mubr.bf16.mxu1 %v1260_v60  ;;  %v1171_v0 = vpop.f32.mrb[16].mxu0 }
 0x15e   :  { %1192 = vmatprep.subr.bf16.mxu1 %v1255_v31  ;;  %v720_v1 = vpop.f32.mrb[17].mxu0 }
 0x15f   :  { %v1172_v2 = vpop.f32.mrb[18].mxu0 }
 0x160   :  { %v723_v3 = vpop.f32.mrb[19].mxu0 }
 0x161   :  { %1200 = vmatpush3.bf16.msra.mxu1 %v1255_v31 }
 0x164   :  { %1178 = vmatmul.mubr.bf16.vlgmr.msra.gmra.mrb[8].mxu1 %v1261_v61 }
 0x165   :  { %1181 = vmatprep.mubr.bf16.mxu1 %v1262_v62  ;;  %v1175_v4 = vpop.f32.mrb[20].mxu0 }
 0x166   :  { %v736_v5 = vpop.f32.mrb[21].mxu0 }
 0x167   :  { %v1176_v6 = vpop.f32.mrb[22].mxu0 }
 0x168   :  { %v739_v7 = vpop.f32.mrb[23].mxu0 }
 0x16c   :  { %1182 = vmatmul.mubr.bf16.gmra.mrb[12].mxu1 %v1263_v63 }
 0x217   :  { %v1139_v8 = vpop.f32.mrb[0].mxu1 }
 0x218   :  { %v729_v10 = vadd.f32 %v1171_v0, %v1139_v8  ;;  %v527_v11 = vpop.f32.mrb[1].mxu1 }
 0x219   :  { %v721_v12 = vadd.f32 %v720_v1, %v527_v11  ;;  %v1140_v13 = vpop.f32.mrb[2].mxu1 }
 0x21a   :  { %v792_v14 = vadd.f32 %v1538_v9, %v729_v10  ;;  %v732_v15 = vadd.f32 %v1172_v2, %v1140_v13  ;;  %v530_v16 = vpop.f32.mrb[3].mxu1 }
 0x21b   :  { %v790_v17 = vadd.f32 %v1538_v9, %v721_v12  ;;  %v724_v18 = vadd.f32 %v723_v3, %v530_v16 }
 0x21c   :  { %v793_v19 = vadd.f32 %v1538_v9, %v732_v15  ;;  %v808_v21 = vmax.f32 %v792_v14, 0.0 }
 0x21d   :  { %v791_v20 = vadd.f32 %v1538_v9, %v724_v18  ;;  %v806_v23 = vmax.f32 %v790_v17, 0.0 }
 0x21e   :  { %v809_v22 = vmax.f32 %v793_v19, 0.0 }
 0x21f   :  { %v807_v24 = vmax.f32 %v791_v20, 0.0  ;;  %v1143_v25 = vpop.f32.mrb[4].mxu1 }
 0x220   :  { %v1002_v26 = vpack.c.bf16 %v809_v22, %v808_v21  ;;  %v745_v27 = vadd.f32 %v1175_v4, %v1143_v25  ;;  %v543_v28 = vpop.f32.mrb[5].mxu1 }
 0x221   :  { %v997_v29 = vpack.c.bf16 %v807_v24, %v806_v23  ;;  %v737_v30 = vadd.f32 %v736_v5, %v543_v28  ;;  %v1144_v31 = vpop.f32.mrb[6].mxu1 }
 0x222   :  { %1034 = vst [vmem:[#allocation11 + $0x8] sm:$0xff] %v1002_v26   ;;  %v796_v32 = vadd.f32 %v1538_v9, %v745_v27  ;;  %v748_v33 = vadd.f32 %v1176_v6, %v1144_v31  ;;  %v546_v34 = vpop.f32.mrb[7].mxu1 }
 0x223   :  { %998 = vst [vmem:[#allocation11] sm:$0xff] %v997_v29   ;;  %v794_v35 = vadd.f32 %v1538_v9, %v737_v30  ;;  %v740_v36 = vadd.f32 %v739_v7, %v546_v34 }
 0x224   :  { %v797_v37 = vadd.f32 %v1538_v9, %v748_v33  ;;  %v812_v39 = vmax.f32 %v796_v32, 0.0 }
 0x225   :  { %v795_v38 = vadd.f32 %v1538_v9, %v740_v36  ;;  %v810_v41 = vmax.f32 %v794_v35, 0.0 }
 0x226   :  { %v813_v40 = vmax.f32 %v797_v37, 0.0 }
 0x227   :  { %v811_v42 = vmax.f32 %v795_v38, 0.0 }
 0x228   :  { %v1012_v43 = vpack.c.bf16 %v813_v40, %v812_v39 }
 0x229   :  { %v1007_v44 = vpack.c.bf16 %v811_v42, %v810_v41 }
 0x22a   :  { %1036 = vst [vmem:[#allocation11 + $0x18] sm:$0xff] %v1012_v43  }
 0x22b   :  { %1035 = vst [vmem:[#allocation11 + $0x10] sm:$0xff] %v1007_v44  }
 0x237   :  { %v1179_v45 = vpop.f32.mrb[8].mxu1 }
 0x238   :  { %v800_v46 = vadd.f32 %v1179_v45, %v1538_v9  ;;  %v752_v47 = vpop.f32.mrb[9].mxu1 }
 0x239   :  { %v798_v48 = vadd.f32 %v1538_v9, %v752_v47  ;;  %v1180_v49 = vpop.f32.mrb[10].mxu1 }
 0x23a   :  { %v801_v50 = vadd.f32 %v1180_v49, %v1538_v9  ;;  %v755_v51 = vpop.f32.mrb[11].mxu1  ;;  %v816_v53 = vmax.f32 %v800_v46, 0.0 }
 0x23b   :  { %v799_v52 = vadd.f32 %v1538_v9, %v755_v51  ;;  %v814_v55 = vmax.f32 %v798_v48, 0.0 }
 0x23c   :  { %v817_v54 = vmax.f32 %v801_v50, 0.0 }
 0x23d   :  { %v815_v56 = vmax.f32 %v799_v52, 0.0 }
 0x23e   :  { %v1022_v57 = vpack.c.bf16 %v817_v54, %v816_v53 }
 0x23f   :  { %v1017_v58 = vpack.c.bf16 %v815_v56, %v814_v55  ;;  %v1183_v59 = vpop.f32.mrb[12].mxu1 }
 0x240   :  { %1038 = vst [vmem:[#allocation11 + $0x28] sm:$0xff] %v1022_v57   ;;  %v804_v60 = vadd.f32 %v1183_v59, %v1538_v9  ;;  %v768_v61 = vpop.f32.mrb[13].mxu1 }
 0x241   :  { %1037 = vst [vmem:[#allocation11 + $0x20] sm:$0xff] %v1017_v58   ;;  %v802_v62 = vadd.f32 %v1538_v9, %v768_v61  ;;  %v1184_v63 = vpop.f32.mrb[14].mxu1 }
 0x242   :  { %v805_v0 = vadd.f32 %v1184_v63, %v1538_v9  ;;  %v771_v1 = vpop.f32.mrb[15].mxu1  ;;  %v820_v3 = vmax.f32 %v804_v60, 0.0 }
 0x243   :  { %v803_v2 = vadd.f32 %v1538_v9, %v771_v1  ;;  %v818_v5 = vmax.f32 %v802_v62, 0.0 }
 0x244   :  { %v821_v4 = vmax.f32 %v805_v0, 0.0 }
 0x245   :  { %v819_v6 = vmax.f32 %v803_v2, 0.0 }
 0x246   :  { %v1032_v7 = vpack.c.bf16 %v821_v4, %v820_v3 }
 0x247   :  { %v1027_v8 = vpack.c.bf16 %v819_v6, %v818_v5 }
 0x248   :  { %1040 = vst [vmem:[#allocation11 + $0x38] sm:$0xff] %v1032_v7  }
 0x249   :  { %1039 = vst [vmem:[#allocation11 + $0x30] sm:$0xff] %v1027_v8  }
 0x24a   :  { %1363 = shalt.err (!%p1360_p8)
}
 0x24b   :  { %s1364_s22 = scalar_lea.hbm %s1576_s5, 1024 }
 0x24c   :  { %p1365_p9 = scmp.ne.s32.totalorder %s1576_s5, %s1364_s22  ;;  %p1368_p10 = scmp.lt.u32.totalorder %s1364_s22, %s1576_s5 }
 0x24e   :  { %p1370_p11 = pnand %p1368_p10, %p1365_p9 }
 0x250   :  { %1373 = shalt.err (!%p1370_p11)
}
 0x251   :  { %913 = dma.vmem_to_hbm [thread:$0]  %s908_s17, 1024, %s1576_s5, [#allocation5], %s1384_s30, %s1384_s30, %s1385_s6  }
 0x252   :  { %1380 = dma.done.wait [#allocation5], 1024  }
 0x253   :  { %1381 = vsyncadd [#allocation5], 4294966272 }
 0x254   :  { %917 = vsyncpa [#allocation4], 1 }
 0x255   :  { %918 = vsyncpa [#allocation7], 1 }
 0x256   :  { %919 = vsyncpa [#allocation10], 1 }
 0x257   :  { %920 = vsyncpa [#allocation5], 1 }

</bundles_post_ra>
